<compile_context>
chip_gen: v7x
topology: tpu7x:2x2x1
jax: 0.10.0
libtpu: 0.0.40
codegen_flags: <defaults>
</compile_context>

<pallas_src>
import functools

import jax
import jax.numpy as jnp
from jax.experimental import pallas as pl
from jax.experimental.pallas import tpu as pltpu


def _senet_kernel(x_ref, w1t_ref, b1_ref, w2t_ref, b2_ref, out_ref, *,
                  inv_hw, use_mxu):
    # x_ref / out_ref : (Bt, C, HW)   natural layout, HW on lanes
    # w1t_ref : (C, Ce) f32, b1_ref : (1, Ce) f32
    # w2t_ref : (Ce, C) f32, b2_ref : (1, C)  f32

    # --- squeeze: global average pool over spatial dims, f32 accumulation ---
    # Read from the ref (no long-lived SSA binding of the multi-MiB tile).
    s = jnp.sum(x_ref[...].astype(jnp.float32), axis=2) * inv_hw        # (Bt, C)

    # --- excitation: FC1 -> ReLU -> FC2 ---
    if use_mxu:
        z = jnp.dot(s, w1t_ref[...], preferred_element_type=jnp.float32) \
            + b1_ref[...]                                                # (Bt, Ce)
        z = jnp.maximum(z, 0.0)
        g = jnp.dot(z, w2t_ref[...], preferred_element_type=jnp.float32) \
            + b2_ref[...]                                                # (Bt, C)
    else:
        # Tiny C/Ce: VPU broadcast-multiply + reduce (skip MXU latency for
        # matmuls far below one MXU tile).
        z = jnp.sum(s[:, :, None] * w1t_ref[...][None, :, :], axis=1) \
            + b1_ref[...]                                                # (Bt, Ce)
        z = jnp.maximum(z, 0.0)
        g = jnp.sum(z[:, :, None] * w2t_ref[...][None, :, :], axis=1) \
            + b2_ref[...]                                                # (Bt, C)

    # sigmoid = 1 / (1 + exp(-g)) : exp and approx reciprocal both on the EUP.
    gate = pl.reciprocal(1.0 + jnp.exp(-g), approx=True)                 # (Bt, C)

    # --- scale: broadcast gate over spatial positions; clean load-mul-store ---
    out_ref[...] = (gate[:, :, None] * x_ref[...]).astype(out_ref.dtype)


def _round_up(v, m):
    return (v + m - 1) // m * m


def senet_forward(x, w1, b1, w2, b2):
    """SE block forward.

    x : (N, C, H, W)   f32 or bf16
    w1: (Ce, C), b1: (Ce,)   -- excite_conv1 (1x1 conv == FC over channels)
    w2: (C, Ce), b2: (C,)    -- excite_conv2
    """
    N, C, H, W = x.shape
    Ce = w1.shape[0]
    HW = H * W
    itemsize = jnp.dtype(x.dtype).itemsize

    # ---- generation-aware VMEM budget ----
    try:
        vmem_cap = pltpu.get_tpu_info().vmem_capacity_bytes
    except Exception:
        vmem_cap = 64 * 1024 * 1024          # conservative fallback (v7x-sized)
    if vmem_cap >= 128 * 1024 * 1024:        # v5e / v6e
        data_budget = 56 << 20
        vmem_limit = 80 << 20
    else:                                    # v7x (64 MiB physical)
        data_budget = 44 << 20
        vmem_limit = 52 << 20

    # ---- padded per-image VMEM footprint (sublane/lane roundup) ----
    sublane = max(8, 8 * 4 // itemsize)      # 8 for f32, 16 for bf16
    image_bytes = _round_up(C, sublane) * _round_up(HW, 128) * itemsize
    per_image = 4 * image_bytes              # double-buffered input + output

    if per_image > data_budget:
        # TODO(synk): 2-pass (HW-split accumulate, then scale) path for single
        # images whose padded tile alone exceeds the VMEM budget.
        if per_image > vmem_cap - (8 << 20):
            raise NotImplementedError(
                "single-image SE tile exceeds VMEM; needs the 2-pass path")
        data_budget = per_image
        vmem_limit = min(vmem_cap - (4 << 20), per_image + (8 << 20))

    # ---- grid sizing: big tiles, but >= 2 (even) steps for v7x megacore ----
    bt_max = max(1, data_budget // per_image)
    if N >= 2:
        steps = max(2, pl.cdiv(N, bt_max))
        if steps % 2 == 1:
            steps += 1
        steps = min(steps, N)                # no empty grid steps
        bt = pl.cdiv(N, steps)
    else:
        bt = 1
    grid = (pl.cdiv(N, bt),)                 # non-divisor N -> padded tail block

    use_mxu = (C >= 128) and (Ce >= 8)
    kernel = functools.partial(_senet_kernel, inv_hw=1.0 / HW, use_mxu=use_mxu)

    # Weights stay f32 regardless of x dtype (tiny; keeps gate math precise).
    w1t = jnp.transpose(w1).astype(jnp.float32)       # (C, Ce)
    w2t = jnp.transpose(w2).astype(jnp.float32)       # (Ce, C)
    b1r = b1.reshape(1, Ce).astype(jnp.float32)
    b2r = b2.reshape(1, C).astype(jnp.float32)

    x_flat = x.reshape(N, C, HW)                      # free reshape, no HBM copy

    cost = pl.CostEstimate(
        flops=2 * N * C * HW + 4 * N * C * Ce,
        transcendentals=N * C,
        bytes_accessed=2 * N * C * HW * itemsize + (2 * C * Ce + Ce + C) * 4,
    )

    out_flat = pl.pallas_call(
        kernel,
        out_shape=jax.ShapeDtypeStruct((N, C, HW), x.dtype),
        grid_spec=pltpu.PrefetchScalarGridSpec(
            num_scalar_prefetch=0,
            grid=grid,
            in_specs=[
                pl.BlockSpec((bt, C, HW), lambda b: (b, 0, 0)),
                pl.BlockSpec((C, Ce), lambda b: (0, 0)),
                pl.BlockSpec((1, Ce), lambda b: (0, 0)),
                pl.BlockSpec((Ce, C), lambda b: (0, 0)),
                pl.BlockSpec((1, C), lambda b: (0, 0)),
            ],
            out_specs=pl.BlockSpec((bt, C, HW), lambda b: (b, 0, 0)),
        ),
        compiler_params=pltpu.CompilerParams(
            dimension_semantics=("parallel",),
            vmem_limit_bytes=vmem_limit,
        ),
        cost_estimate=cost,
    )(x_flat, w1t, b1r, w2t, b2r)

    return out_flat.reshape(N, C, H, W)


def senet_reference(x, w1, b1, w2, b2):
    """Pure-JAX reference mirroring the PyTorch forward."""
    xf = x.astype(jnp.float32)
    s = jnp.mean(xf, axis=(2, 3))                      # AdaptiveAvgPool2d(1)
    z = jnp.maximum(s @ w1.T + b1, 0.0)                # 1x1 conv + ReLU
    g = jax.nn.sigmoid(z @ w2.T + b2)                  # 1x1 conv + sigmoid
    return g[:, :, None, None] * xf                    # scale


def _make_params(key, C, s_ratio):
    Ce = max(1, C // s_ratio)
    k1, kb1, k2, kb2 = jax.random.split(key, 4)
    w1 = 0.3 * jax.random.normal(k1, (Ce, C), dtype=jnp.float32)   # excite_conv1.weight
    b1 = 0.1 * jax.random.normal(kb1, (Ce,), dtype=jnp.float32)    # excite_conv1.bias
    w2 = 0.3 * jax.random.normal(k2, (C, Ce), dtype=jnp.float32)   # excite_conv2.weight
    b2 = 0.1 * jax.random.normal(kb2, (C,), dtype=jnp.float32)     # excite_conv2.bias
    return w1, b1, w2, b2


if __name__ == "__main__":
    key = jax.random.PRNGKey(0)
    kx1, kp1, kx2, kp2, kx3 = jax.random.split(key, 5)

    # Config 1: module defaults (in_features=8, s_ratio=2 -> Ce=4), f32.
    # VPU excitation path; tolerance covers the approx-reciprocal gate (~1e-4).
    x1 = jax.random.normal(kx1, (2, 8, 16, 16), dtype=jnp.float32)
    p1 = _make_params(kp1, 8, 2)
    out1 = jax.block_until_ready(senet_forward(x1, *p1))
    ref1 = senet_reference(x1, *p1)
    if not jnp.allclose(out1, ref1, atol=2e-3, rtol=2e-3):
        raise AssertionError("Pallas SENet mismatch (config 1: f32, VPU path)")

    # Config 2: late-stage SE shape (C=128, s_ratio=16 -> Ce=8, HW=16).
    # MXU excitation path; tolerance covers default-precision f32 MXU matmuls.
    x2 = jax.random.normal(kx2, (4, 128, 4, 4), dtype=jnp.float32)
    p2 = _make_params(kp2, 128, 16)
    out2 = jax.block_until_ready(senet_forward(x2, *p2))
    ref2 = senet_reference(x2, *p2)
    if not jnp.allclose(out2, ref2, atol=2e-2, rtol=2e-2):
        raise AssertionError("Pallas SENet mismatch (config 2: f32, MXU path)")

    # Config 3: bf16 I/O with a non-divisor batch (N=3) to exercise the
    # pl.cdiv grid / padded tail block; gate math still accumulates in f32.
    x3 = jax.random.normal(kx3, (3, 8, 16, 16), dtype=jnp.bfloat16)
    out3 = jax.block_until_ready(senet_forward(x3, *p1))
    ref3 = senet_reference(x3, *p1)
    if not jnp.allclose(out3.astype(jnp.float32), ref3, atol=5e-2, rtol=5e-2):
        raise AssertionError("Pallas SENet mismatch (config 3: bf16, tail block)")

    print("KERNEL_OK")
</pallas_src>

<mosaic_0001>
module attributes {stable_mosaic.version = 11 : i64} {
  func.func @_senet_kernel(%arg0: i32, %arg1: memref<1x8x256xf32, #tpu.memory_space<vmem>>, %arg2: memref<8x4xf32, #tpu.memory_space<vmem>>, %arg3: memref<1x4xf32, #tpu.memory_space<vmem>>, %arg4: memref<4x8xf32, #tpu.memory_space<vmem>>, %arg5: memref<1x8xf32, #tpu.memory_space<vmem>>, %arg6: memref<1x8x256xf32, #tpu.memory_space<vmem>>) attributes {dimension_semantics = [#tpu.dimension_semantics<parallel>], iteration_bounds = array<i64: 2>, scalar_prefetch = 0 : i64, scratch_operands = 0 : i64, tpu.core_type = #tpu.core_type<tc>, window_params = [{transform_indices = @transform_0, window_bounds = array<i64: 1, 8, 256>}, {pipeline_mode = #tpu.pipeline_mode<synchronous>, transform_indices = @transform_1, window_bounds = array<i64: 8, 4>}, {pipeline_mode = #tpu.pipeline_mode<synchronous>, transform_indices = @transform_2, window_bounds = array<i64: 1, 4>}, {pipeline_mode = #tpu.pipeline_mode<synchronous>, transform_indices = @transform_3, window_bounds = array<i64: 4, 8>}, {pipeline_mode = #tpu.pipeline_mode<synchronous>, transform_indices = @transform_4, window_bounds = array<i64: 1, 8>}, {transform_indices = @transform_5, window_bounds = array<i64: 1, 8, 256>}]} {
    %c0 = arith.constant 0 : index
    %c0_0 = arith.constant 0 : index
    %c0_1 = arith.constant 0 : index
    %0 = vector.load %arg1[%c0, %c0_0, %c0_1] : memref<1x8x256xf32, #tpu.memory_space<vmem>>, vector<1x8x256xf32>
    %cst = arith.constant dense<0.000000e+00> : vector<1x8xf32>
    %1 = vector.multi_reduction <add>, %0, %cst [2] : vector<1x8x256xf32> to vector<1x8xf32>
    %cst_2 = arith.constant 3.906250e-03 : f32
    %2 = vector.broadcast %cst_2 : f32 to vector<1x8xf32>
    %3 = arith.mulf %1, %2 : vector<1x8xf32>
    %4 = vector.shape_cast %3 : vector<1x8xf32> to vector<1x8x1xf32>
    %c0_3 = arith.constant 0 : index
    %c0_4 = arith.constant 0 : index
    %5 = vector.load %arg2[%c0_3, %c0_4] : memref<8x4xf32, #tpu.memory_space<vmem>>, vector<8x4xf32>
    %6 = vector.shape_cast %5 : vector<8x4xf32> to vector<1x8x4xf32>
    %7 = vector.broadcast %4 : vector<1x8x1xf32> to vector<1x8x4xf32>
    %8 = arith.mulf %7, %6 : vector<1x8x4xf32>
    %cst_5 = arith.constant dense<0.000000e+00> : vector<1x4xf32>
    %9 = vector.multi_reduction <add>, %8, %cst_5 [1] : vector<1x8x4xf32> to vector<1x4xf32>
    %c0_6 = arith.constant 0 : index
    %c0_7 = arith.constant 0 : index
    %10 = vector.load %arg3[%c0_6, %c0_7] : memref<1x4xf32, #tpu.memory_space<vmem>>, vector<1x4xf32>
    %11 = arith.addf %9, %10 : vector<1x4xf32>
    %cst_8 = arith.constant 0.000000e+00 : f32
    %12 = vector.broadcast %cst_8 : f32 to vector<1x4xf32>
    %13 = arith.maximumf %11, %12 : vector<1x4xf32>
    %14 = vector.shape_cast %13 : vector<1x4xf32> to vector<1x4x1xf32>
    %c0_9 = arith.constant 0 : index
    %c0_10 = arith.constant 0 : index
    %15 = vector.load %arg4[%c0_9, %c0_10] : memref<4x8xf32, #tpu.memory_space<vmem>>, vector<4x8xf32>
    %16 = vector.shape_cast %15 : vector<4x8xf32> to vector<1x4x8xf32>
    %17 = vector.broadcast %14 : vector<1x4x1xf32> to vector<1x4x8xf32>
    %18 = arith.mulf %17, %16 : vector<1x4x8xf32>
    %cst_11 = arith.constant dense<0.000000e+00> : vector<1x8xf32>
    %19 = vector.multi_reduction <add>, %18, %cst_11 [1] : vector<1x4x8xf32> to vector<1x8xf32>
    %c0_12 = arith.constant 0 : index
    %c0_13 = arith.constant 0 : index
    %20 = vector.load %arg5[%c0_12, %c0_13] : memref<1x8xf32, #tpu.memory_space<vmem>>, vector<1x8xf32>
    %21 = arith.addf %19, %20 : vector<1x8xf32>
    %cst_14 = arith.constant 0.000000e+00 : f32
    %22 = vector.broadcast %cst_14 : f32 to vector<1x8xf32>
    %23 = arith.subf %22, %21 : vector<1x8xf32>
    %24 = math.exp %23 : vector<1x8xf32>
    %cst_15 = arith.constant 1.000000e+00 : f32
    %25 = vector.broadcast %cst_15 : f32 to vector<1x8xf32>
    %26 = arith.addf %25, %24 : vector<1x8xf32>
    %27 = tpu.reciprocal %26 {approx = true} : vector<1x8xf32> -> vector<1x8xf32>
    %28 = vector.shape_cast %27 : vector<1x8xf32> to vector<1x8x1xf32>
    %c0_16 = arith.constant 0 : index
    %c0_17 = arith.constant 0 : index
    %c0_18 = arith.constant 0 : index
    %29 = vector.load %arg1[%c0_16, %c0_17, %c0_18] : memref<1x8x256xf32, #tpu.memory_space<vmem>>, vector<1x8x256xf32>
    %30 = vector.broadcast %28 : vector<1x8x1xf32> to vector<1x8x256xf32>
    %31 = arith.mulf %30, %29 : vector<1x8x256xf32>
    %c0_19 = arith.constant 0 : index
    %c0_20 = arith.constant 0 : index
    %c0_21 = arith.constant 0 : index
    %32 = vector.load %arg6[%c0_19, %c0_20, %c0_21] : memref<1x8x256xf32, #tpu.memory_space<vmem>>, vector<1x8x256xf32>
    tpu.vector_store %arg6[%c0_19, %c0_20, %c0_21], %31 {strides = array<i32>} : memref<1x8x256xf32, #tpu.memory_space<vmem>>, vector<1x8x256xf32>,
    return
  }
  func.func @transform_0(%arg0: i32) -> (i32, i32, i32) {
    %c0_i32 = arith.constant 0 : i32
    %c0_i32_0 = arith.constant 0 : i32
    %c0_i32_1 = arith.constant 0 : i32
    return %arg0, %c0_i32, %c0_i32_0 : i32, i32, i32
  }
  func.func @transform_1(%arg0: i32) -> (i32, i32) {
    %c0_i32 = arith.constant 0 : i32
    %c0_i32_0 = arith.constant 0 : i32
    %c0_i32_1 = arith.constant 0 : i32
    return %c0_i32, %c0_i32_0 : i32, i32
  }
  func.func @transform_2(%arg0: i32) -> (i32, i32) {
    %c0_i32 = arith.constant 0 : i32
    %c0_i32_0 = arith.constant 0 : i32
    %c0_i32_1 = arith.constant 0 : i32
    return %c0_i32, %c0_i32_0 : i32, i32
  }
  func.func @transform_3(%arg0: i32) -> (i32, i32) {
    %c0_i32 = arith.constant 0 : i32
    %c0_i32_0 = arith.constant 0 : i32
    %c0_i32_1 = arith.constant 0 : i32
    return %c0_i32, %c0_i32_0 : i32, i32
  }
  func.func @transform_4(%arg0: i32) -> (i32, i32) {
    %c0_i32 = arith.constant 0 : i32
    %c0_i32_0 = arith.constant 0 : i32
    %c0_i32_1 = arith.constant 0 : i32
    return %c0_i32, %c0_i32_0 : i32, i32
  }
  func.func @transform_5(%arg0: i32) -> (i32, i32, i32) {
    %c0_i32 = arith.constant 0 : i32
    %c0_i32_0 = arith.constant 0 : i32
    %c0_i32_1 = arith.constant 0 : i32
    return %arg0, %c0_i32, %c0_i32_0 : i32, i32, i32
  }
}

</mosaic_0001>

<bundles_post_ra>
// kernel: tpu_custom_call.1
= control target key start
LH: loop header
LB: loop body
LE: loop exit
PB: predicated region body
PF: predicated region fallthrough
CT: control target
= control target key end

     0   :  { %10 = vsyncpa [#allocation3], 0  ;;  %s753_s0 = inlined_call_operand.hbm [shape: f32[2,8,256], index: 0, kind: input, shape index: {}]   ;;  %s754_s1 = inlined_call_operand.vmem [shape: f32[8,4], index: 1, kind: input, shape index: {}]   ;;  %s755_s2 = inlined_call_operand.vmem [shape: f32[1,4], index: 2, kind: input, shape index: {}]   ;;  %s756_s3 = inlined_call_operand.vmem [shape: f32[4,8], index: 3, kind: input, shape index: {}]   ;;  %s757_s4 = inlined_call_operand.vmem [shape: f32[1,8], index: 4, kind: input, shape index: {}]   ;;  %s758_s5 = inlined_call_operand.hbm [shape: f32[2,8,256], index: 5, kind: output, shape index: {}]  }
   0x1   :  { %12 = vsyncpa [#allocation3 + $0x1], 0 }
   0x2   :  { %13 = vsyncpa [#allocation4], 0 }
   0x3   :  { %15 = vsyncpa [#allocation4 + $0x1], 0  ;;  %s576_s18 = smov 0   ;;  %s578_s19 = smov 0  }
   0x4   :  { %s580_s20 = smov 0   ;;  %s582_s21 = smov 0  }
   0x5 LB: > { %s597_s22 = sadd.s32 4294967295, %s542_s21   ;;  %s380_s23 = sadd.s32 4294967294, %s542_s21   ;;  %s542_s21 = sphi %s582_s21, %s773_s21   ;;  %s538_s20 = sphi %s580_s20, %s772_s20   ;;  %s534_s19 = sphi %s578_s19, %s771_s19   ;;  %s530_s18 = sphi %s576_s18, %s770_s18  }
   0x6   : > { %s601_s24 = sadd.s32 1, %s542_s21   ;;  %s28_s25 = sadd.s32 1, %s538_s20 }
   0x7   : > { %s25_s26 = ssub.s32 %s542_s21, %s601_s24  ;;  %p35_p0 = scmp.ne.s32.totalorder %s538_s20, %s534_s19 }
   0x8   : > { %p26_p1 = scmp.eq.s32.totalorder %s25_s26, 0  ;;  %p36_p2 = scmp.eq.s32.totalorder %s542_s21, 0 }
   0x9   : > { %p41_p3 = scmp.ne.s32.totalorder %s534_s19, %s530_s18  ;;  %p42_p4 = scmp.eq.s32.totalorder %s597_s22, 0 }
   0xa   : > { %s613_s27 = scalar_select %p26_p1, %s538_s20, %s28_s25  }
   0xb   : > { %p615_p5 = por %p36_p2, %p35_p0  ;;  %p619_p6 = por %p42_p4, %p41_p3 }
   0xc   : > { %p149_p7 = scmp.eq.s32.totalorder %s597_s22, 1  ;;  %p155_p8 = scmp.eq.s32.totalorder %s380_s23, 1 }
   0xd   : > { %p408_p10 = scmp.lt.s32.totalorder %s542_s21, 2  ;;  %s187_s7 = sand.u32 1, %s538_s20  }
   0xe   : > { %p626_p11 = por %p149_p7, %p35_p0  ;;  %p630_p12 = por %p155_p8, %p41_p3 }
   0xf   : > { %s394_s8 = sshll.u32 %s542_s21, 8  ;;  %s383_s9 = sshll.u32 %s187_s7, 4 }
  0x10   : > { %s762_s30 = scalar_select %p626_p11, 1, 0 }
  0x11   : > { %s763_s6 = scalar_select %p630_p12, 1, 0 }
  0x12   : > { %s639_s12 = scalar_lea.hbm %s753_s0, %s394_s8  ;;  %s191_s13 = scalar_lea.vmem [#allocation2], %s383_s9 }
  0x13   : > { %s199_s14 = sshll.u32 %s191_s13, 4  ;;  %p643_p13 = pnand %p408_p10, %p615_p5  ;;  %s647_s14 = int_to_ptr.vmem [resolvable:$true] %s199_s14 }
  0x14   : > { %s188_s16 = scalar_lea.sflag [#allocation3], %s187_s7  ;;  %s446_s17 = scalar_lea.hbm %s639_s12, 256 }
  0x15   : > { %p447_p2 = scmp.ne.s32.totalorder %s639_s12, %s446_s17  ;;  %p448_p3 = pneg %p643_p13 }
  0x16   : > { %s451_s26 = scalar_lea.hbm %s753_s0, 512  ;;  %p452_p5 = scmp.lt.u32.totalorder %s639_s12, %s753_s0 }
  0x17   : > { %p449_p4 = pnand %p448_p3, %p447_p2  ;;  %p453_p8 = scmp.lt.u32.totalorder %s451_s26, %s446_s17 }
  0x18   : > { %p455_p9 = scmp.lt.u32.totalorder %s446_s17, %s639_s12 }
  0x19   : > { %p450_p7 = pneg %p449_p4  ;;  %p454_p10 = por %p453_p8, %p452_p5 }
  0x1b   : > { %p456_p0 = por %p455_p9, %p454_p10 }
  0x1d   : > { %p457_p1 = pnand %p456_p0, %p450_p7 }
  0x1f   : > { %460 = shalt.err (!%p457_p1)
}
  0x20   : > { %s461_s7 = scalar_lea.vmem %s647_s14, 256  ;;  %s544_s9 = smov [#allocation2]  }
  0x21   : > { %p462_p2 = scmp.ne.s32.totalorder %s647_s14, %s461_s7  ;;  %s466_s10 = sshll.u32 %s544_s9, 4  ;;  %s467_s10 = int_to_ptr.vmem [resolvable:$false] %s466_s10 }
  0x22   : > { %s468_s11 = scalar_lea.vmem %s467_s10, 512  ;;  %p469_p11 = scmp.lt.s32.totalorder %s647_s14, %s467_s10 }
  0x23   : > { %p464_p4 = pnand %p462_p2, %p448_p3  ;;  %p470_p5 = scmp.lt.s32.totalorder %s468_s11, %s461_s7 }
  0x25   : > { %p465_p12 = pneg %p464_p4  ;;  %p471_p8 = por %p470_p5, %p469_p11 }
  0x27   : > { %p472_p9 = pnand %p471_p8, %p465_p12 }
  0x29   : > { %475 = shalt.err (!%p472_p9)
}
  0x2a   : > { %403 = dma.hbm_to_vmem [thread:$0]  (!%p643_p13), %s639_s12, 256, %s647_s14, %s188_s16  }
  0x2b   : > { %p765_p0 = scmp.lt.s32.totalorder %s542_s21, 3  ;;  %p766_p1 = scmp.ge.s32.totalorder %s542_s21, 1 }
  0x2d   : > { %p205_p3 = pnand %p766_p1, %p765_p0 }
  0x2e   : > { %s681_s13 = sand.u32 (!%p205_p3), 1, %s534_s19  }
  0x2f   : > { %208 = sbr.rel (%p205_p3) target bundleno = 516 (0x204), region = 40  ;;  %s387_s17 = sshll.u32 (!%p205_p3), %s681_s13, 4 }
  0x30   : > { %s211_s23 = scalar_lea.sflag (!%p205_p3), [#allocation3], %s681_s13  ;;  %s214_s15 = scalar_lea.vmem (!%p205_p3), [#allocation2], %s387_s17 }
  0x36   : > { %521 = dma.done.wait (%p619_p6), %s211_s23, 256  }
  0x37   : > { %523 = vsyncadd (%p619_p6), %s211_s23, 4294967040  ;;  %v241_v0 = vld [vmem:[%s214_s15] sm:$0xff]  ;;  %v242_v1 = vld [vmem:[%s214_s15 + $0x8] sm:$0xff]  ;;  %vm249_vm0 = vcmask 31744   ;;  %v260_v11 = vlaneseq  ;;  %vm269_vm1 = vcmask 60416   ;;  %s395_s7 = sshll.u32 %s597_s22, 8 }
  0x38   : > { %v243_v2 = vadd.f32 %v242_v1, %v241_v0  ;;  %v247_v3 = vld [vmem:[%s754_s1] sm:$0xff]  ;;  %s240_s9 = scalar_lea.vmem [#allocation5], %s387_s17  ;;  %s709_s15 = scalar_lea.hbm %s758_s5, %s395_s7 }
  0x39   : > { %v261_v14 = vshrl.u32 %v260_v11, 7  ;;  %v257_v15 = vld [vmem:[%s755_s2] sm:$0x1]  ;;  %s310_s10 = sshll.u32 %s240_s9, 4  ;;  %s296_s12 = scalar_lea.sflag [#allocation4], %s681_s13  ;;  %s711_s10 = int_to_ptr.vmem [resolvable:$true] %s310_s10 }
  0x3a   : > { %244 = vadd.xlane.f32.xlu0 %v243_v2  ;;  %v267_v21 = vld [vmem:[%s756_s3] sm:$0xf]  ;;  %s476_s22 = scalar_lea.vmem %s711_s10, 256  ;;  %p767_p11 = scmp.ne.s32.totalorder %s762_s30, 0 }
  0x3b   : > { %v262_v18 = vsub.s32 0, %v261_v14  ;;  %v277_v30 = vld [vmem:[%s757_s4] sm:$0x1]  ;;  %p477_p6 = scmp.ne.s32.totalorder %s711_s10, %s476_s22  ;;  %s545_s17 = smov [#allocation5]  }
  0x3c   : > { %s480_s14 = sshll.u32 %s545_s17, 4  ;;  %s481_s14 = int_to_ptr.vmem [resolvable:$false] %s480_s14 }
  0x3d   : > { %p478_p12 = pnand %p477_p6, %p767_p11  ;;  %s482_s29 = scalar_lea.vmem %s481_s14, 512 }
  0x3e   : > { %p483_p7 = scmp.lt.s32.totalorder %s711_s10, %s481_s14  ;;  %p484_p10 = scmp.lt.s32.totalorder %s482_s29, %s476_s22 }
  0x3f   : > { %p479_p13 = pneg %p478_p12 }
  0x40   : > { %p485_p2 = por %p484_p10, %p483_p7 }
  0x42   : > { %p486_p4 = pnand %p485_p2, %p479_p13 }
  0xc7   : > { %v245_v4 = vpop.xlane.xlu0 %244 }
  0xc8   : > { %v246_v5 = vmul.f32 0.00390625, %v245_v4 }
  0xca   : > { %v248_v6 = vmul.f32 %v247_v3, %v246_v5 }
  0xcc   : > { %v250_v7 = vsel %vm249_vm0, %v248_v6, 0.0 }
  0xcd   : > { %v251_v8 = vrot.slane %v250_v7, 4 }
  0xcf   : > { %v252_v9 = vadd.f32 %v251_v8, %v250_v7 }
  0xd1   : > { %v253_v10 = vrot.slane %v252_v9, 2 }
  0xd3   : > { %v254_v12 = vadd.f32 %v253_v10, %v252_v9 }
  0xd5   : > { %v255_v13 = vrot.slane %v254_v12, 1 }
  0xd7   : > { %v256_v16 = vadd.f32 %v255_v13, %v254_v12 }
  0xd9   : > { %v258_v17 = vadd.f32 %v257_v15, %v256_v16 }
  0xdb   : > { %v259_v19 = vmax.f32 %v258_v17, 0.0 }
  0xdd   : > { %v263_v20 = vrot.slane %v259_v19, %v262_v18 }
  0xdf   : > { %265 = vbcast.lane.b32.xlu0 %v263_v20, 256 }
 0x151   : > { %v266_v22 = vpop.permute.xlu0 %265 }
 0x152   : > { %v268_v23 = vmul.f32 %v267_v21, %v266_v22 }
 0x154   : > { %v270_v24 = vsel %vm269_vm1, %v268_v23, 0.0 }
 0x155   : > { %v271_v25 = vrot.slane %v270_v24, 4 }
 0x157   : > { %v272_v26 = vadd.f32 %v271_v25, %v270_v24 }
 0x159   : > { %v273_v27 = vrot.slane %v272_v26, 2 }
 0x15b   : > { %v274_v28 = vadd.f32 %v273_v27, %v272_v26 }
 0x15d   : > { %v275_v29 = vrot.slane %v274_v28, 1 }
 0x15f   : > { %v276_v31 = vadd.f32 %v275_v29, %v274_v28 }
 0x161   : > { %v278_v32 = vadd.f32 %v277_v30, %v276_v31 }
 0x163   : > { %v279_v33 = vsub.f32 0.0, %v278_v32 }
 0x165   : > { %v280_v34 = vmul.f32 1.442695, %v279_v33 }
 0x167   : > { %442 = vpow2.f32 %v280_v34 }
 0x171   : > { %v443_v35 = vpop.eup %442 }
 0x172   : > { %v282_v36 = vadd.f32 1.0, %v443_v35 }
 0x174   : > { %444 = vrcp.f32 %v282_v36 }
 0x17e   : > { %v445_v37 = vpop.eup %444 }
 0x17f   : > { %v287_v38 = vrot.slane %v445_v37, %v262_v18 }
 0x181   : > { %289 = vbcast.lane.b32.xlu1 %v287_v38, 256 }
 0x1f3   : > { %v290_v39 = vpop.permute.xlu1 %289 }
 0x1f4   : > { %v291_v40 = vmul.f32 %v290_v39, %v241_v0  ;;  %v292_v41 = vmul.f32 %v290_v39, %v242_v1 }
 0x1f6   : > { %293 = vst [vmem:[%s240_s9] sm:$0xff] %v291_v40  ;;  %294 = vst [vmem:[%s240_s9 + $0x8] sm:$0xff] %v292_v41 }
 0x1f7   : > { %489 = shalt.err (!%p486_p4)
}
 0x1f8   : > { %s490_s13 = scalar_lea.hbm %s709_s15, 256  ;;  %s494_s26 = scalar_lea.hbm %s758_s5, 512 }
 0x1f9   : > { %p491_p5 = scmp.ne.s32.totalorder %s709_s15, %s490_s13  ;;  %p495_p0 = scmp.lt.u32.totalorder %s709_s15, %s758_s5 }
 0x1fa   : > { %p496_p1 = scmp.lt.u32.totalorder %s494_s26, %s490_s13  ;;  %p498_p6 = scmp.lt.u32.totalorder %s490_s13, %s709_s15 }
 0x1fb   : > { %p492_p8 = pnand %p491_p5, %p767_p11 }
 0x1fc   : > { %p497_p3 = por %p496_p1, %p495_p0 }
 0x1fd   : > { %p493_p9 = pneg %p492_p8 }
 0x1fe   : > { %p499_p12 = por %p498_p6, %p497_p3 }
 0x200   : > { %p500_p13 = pnand %p499_p12, %p493_p9 }
 0x202   : > { %503 = shalt.err (!%p500_p13)
}
 0x203   : > { %398 = dma.vmem_to_hbm [thread:$0]  (%p767_p11), %s711_s10, 256, %s709_s15, %s296_s12  }
 0x204 PF: > { %s322_s7 = sand.u32 1, %s530_s18   ;;  %p768_p7 = scmp.ne.s32.totalorder %s763_s6, 0 }
 0x205   : > { %p769_p10 = scmp.ge.s32.totalorder %s542_s21, 2  ;;  %s323_s9 = scalar_lea.sflag [#allocation4], %s322_s7 }
 0x207   : > { %p405_p2 = pnand %p769_p10, %p768_p7 }
 0x209   : > { %525 = dma.done.wait (!%p405_p2), %s323_s9, 256  }
 0x20a   : > { %527 = vsyncadd (!%p405_p2), %s323_s9, 4294967040  ;;  %p18_p4 = scmp.ge.s32.totalorder %s601_s24, 4   ;;  %s770_s18 = smov %s534_s19 }
 0x20b   : > { %s771_s19 = smov %s538_s20  ;;  %s772_s20 = smov %s613_s27 }
 0x20c   : > { %s773_s21 = smov %s601_s24  ;;  %20 = sbr.rel (!%p18_p4) target bundleno = 5 (0x5), region = 85 }
 0x213   :  { %328 = vsyncpa [#allocation3], 1 }
 0x214   :  { %330 = vsyncpa [#allocation3 + $0x1], 1 }
 0x215   :  { %331 = vsyncpa [#allocation4], 1 }
 0x216   :  { %333 = vsyncpa [#allocation4 + $0x1], 1 }

</bundles_post_ra>
